<compile_context>
chip_gen: v6e
topology: v6e:2x2x1
jax: 0.10.0
libtpu: 0.0.40
codegen_flags: <defaults>
</compile_context>

<pallas_src>
import functools

import jax
import jax.numpy as jnp
from jax import lax
from jax.experimental import pallas as pl
from jax.experimental.pallas import tpu as pltpu

_LANES = 128


def _cdiv(a, b):
    return -(-a // b)


def _round_up(x, m):
    return _cdiv(x, m) * m


def _color_loss_kernel(res_ref, gt_ref, out_ref, acc_ref, *,
                       hw_valid, tiles_per_chunk, r_tile, need_mask):
    c = pl.program_id(0)   # spatial chunk (megacore "parallel" axis)
    n = pl.program_id(1)   # batch element
    t = pl.program_id(2)   # spatial tile within chunk

    @pl.when(jnp.logical_and(n == 0, t == 0))
    def _():
        acc_ref[...] = jnp.zeros_like(acc_ref)

    def load(ref, ch):
        x = ref[0, ch]                      # (r_tile, 128) plane of channel ch
        if x.dtype != jnp.float32:          # cast only if caller passed bf16/etc.
            x = x.astype(jnp.float32)
        return x

    res_r, res_g, res_b = load(res_ref, 0), load(res_ref, 1), load(res_ref, 2)
    gt_r, gt_g, gt_b = load(gt_ref, 0), load(gt_ref, 1), load(gt_ref, 2)

    # Folded math, equivalent to the PyTorch forward:
    #   res = (res+1)*127.5 ; gt = (gt+1)*127.5
    #   r_mean = (res0+gt0)/2 ; r=res0-gt0 ; g=res1-gt1 ; b=res2-gt2
    #   p = (512+r_mean)*r^2/256 + 4*g^2 + (767-r_mean)*b^2/256
    # with r = 127.5*dr etc. and r_mean/256 = 0.2490234375*s + 0.498046875.
    dr = res_r - gt_r
    dg = res_g - gt_g
    db = res_b - gt_b
    s = res_r + gt_r
    cr = 2.498046875 + 0.2490234375 * s     # = 2       + r_mean/256
    cb = 2.498046875 - 0.2490234375 * s     # = 767/256 - r_mean/256
    p = 16256.25 * (cr * dr * dr + 4.0 * dg * dg + cb * db * db)
    v = jnp.sqrt(p + 1e-08)

    if need_mask:
        # Padded tail pixels would contribute sqrt(1e-8) each; zero them out.
        base_row = (c * tiles_per_chunk + t) * r_tile
        row_ids = lax.broadcasted_iota(jnp.int32, v.shape, 0)
        lane_ids = lax.broadcasted_iota(jnp.int32, v.shape, 1)
        idx = (base_row + row_ids) * _LANES + lane_ids
        v = jnp.where(idx < hw_valid, v, 0.0)

    acc_ref[...] += v

    @pl.when(jnp.logical_and(n == pl.num_programs(1) - 1,
                             t == pl.num_programs(2) - 1))
    def _():
        # One sublane reduce per chunk; lane reduce + normalization in wrapper.
        out_ref[...] = jnp.sum(acc_ref[...], axis=0, keepdims=True)


def color_loss(res, gt, *, max_tile_rows=2048, min_rows_per_chunk=512):
    """res, gt: float32 (or bf16) [N, 3, H, W] in [-1, 1]. Returns scalar loss."""
    assert res.shape == gt.shape
    N, C, H, W = res.shape
    assert C == 3, "ColorLoss expects 3 channels (RGB)"

    hw = H * W
    rows = _cdiv(hw, _LANES)                  # rows of 128 lanes
    rows8 = _round_up(rows, 8)                # sublane-aligned row count

    # Use 2 parallel chunks (v7x megacore) only when each chunk still gets big
    # tiles; otherwise a single chunk avoids per-step overhead on v5e/v6e.
    nchunks = 2 if rows8 >= 2 * min_rows_per_chunk else 1

    # Total spatial tiles: enough that each tile fits max_tile_rows, rounded up
    # so chunks get equal tile counts.  r_tile is then the minimal 8-aligned
    # tile height, which keeps padding <= 8*tiles_total rows (never ~2x).
    tiles_total = _round_up(_cdiv(rows8, max_tile_rows), nchunks)
    tiles_per_chunk = tiles_total // nchunks
    r_tile = _round_up(_cdiv(rows8, tiles_total), 8)
    rows_padded = r_tile * tiles_total
    padded_hw = rows_padded * _LANES
    need_mask = padded_hw != hw

    def prep(x):
        x = x.reshape(N, C, hw)
        if padded_hw != hw:
            x = jnp.pad(x, ((0, 0), (0, 0), (0, padded_hw - hw)))
        return x.reshape(N, C, rows_padded, _LANES)

    res_t = prep(res)
    gt_t = prep(gt)

    kernel = functools.partial(
        _color_loss_kernel,
        hw_valid=hw,
        tiles_per_chunk=tiles_per_chunk,
        r_tile=r_tile,
        need_mask=need_mask,
    )

    in_spec = pl.BlockSpec(
        (1, C, r_tile, _LANES),
        lambda c, n, t: (n, 0, c * tiles_per_chunk + t, 0),
    )

    partial_sums = pl.pallas_call(
        kernel,
        out_shape=jax.ShapeDtypeStruct((1, nchunks * _LANES), jnp.float32),
        grid_spec=pltpu.PrefetchScalarGridSpec(
            num_scalar_prefetch=0,
            grid=(nchunks, N, tiles_per_chunk),
            in_specs=[in_spec, in_spec],
            out_specs=pl.BlockSpec((1, _LANES), lambda c, n, t: (0, c)),
            scratch_shapes=[pltpu.VMEM((r_tile, _LANES), jnp.float32)],
        ),
        compiler_params=pltpu.CompilerParams(
            dimension_semantics=("parallel", "arbitrary", "arbitrary"),
            vmem_limit_bytes=32 * 1024 * 1024,
        ),
    )(res_t, gt_t)

    return jnp.sum(partial_sums) / (N * hw * 255.0)


def _color_loss_ref(res, gt):
    """Pure-JAX reference mirroring the PyTorch forward exactly."""
    res = (res + 1.0) * 127.5
    gt = (gt + 1.0) * 127.5
    r_mean = (res[:, 0] + gt[:, 0]) / 2.0
    r = res[:, 0] - gt[:, 0]
    g = res[:, 1] - gt[:, 1]
    b = res[:, 2] - gt[:, 2]
    p_loss_temp = (
        (512.0 + r_mean) * r * r / 256.0
        + 4.0 * g * g
        + (767.0 - r_mean) * b * b / 256.0
    )
    return jnp.mean(jnp.sqrt(p_loss_temp + 1e-08)) / 255.0


if __name__ == "__main__":
    key = jax.random.PRNGKey(0)
    k1, k2 = jax.random.split(key)
    N, C, H, W = 2, 3, 16, 16
    res = jax.random.uniform(k1, (N, C, H, W), jnp.float32, -1.0, 1.0)
    gt = jax.random.uniform(k2, (N, C, H, W), jnp.float32, -1.0, 1.0)

    out = color_loss(res, gt)
    jax.block_until_ready(out)

    ref = _color_loss_ref(res, gt)
    assert jnp.allclose(out, ref, rtol=1e-5, atol=1e-6), (out, ref)

    print("KERNEL_OK")
</pallas_src>

<mosaic_0001>
module attributes {stable_mosaic.version = 11 : i64} {
  func.func @_color_loss_kernel(%arg0: i32, %arg1: i32, %arg2: i32, %arg3: memref<1x3x8x128xf32, #tpu.memory_space<vmem>>, %arg4: memref<1x3x8x128xf32, #tpu.memory_space<vmem>>, %arg5: memref<1x128xf32, #tpu.memory_space<vmem>>, %arg6: memref<8x128xf32, #tpu.memory_space<vmem>>) attributes {dimension_semantics = [#tpu.dimension_semantics<parallel>, #tpu.dimension_semantics<arbitrary>, #tpu.dimension_semantics<arbitrary>], iteration_bounds = array<i64: 1, 2, 1>, scalar_prefetch = 0 : i64, scratch_operands = 1 : i64, tpu.core_type = #tpu.core_type<tc>, window_params = [{transform_indices = @transform_0, window_bounds = array<i64: 1, 3, 8, 128>}, {transform_indices = @transform_1, window_bounds = array<i64: 1, 3, 8, 128>}, {transform_indices = @transform_2, window_bounds = array<i64: 1, 128>}]} {
    %c0_i32 = arith.constant 0 : i32
    %0 = arith.cmpi eq, %arg1, %c0_i32 : i32
    %c0_i32_0 = arith.constant 0 : i32
    %1 = arith.cmpi eq, %arg2, %c0_i32_0 : i32
    %2 = arith.andi %0, %1 : i1
    %3 = arith.extui %2 : i1 to i32
    %c0_i32_1 = arith.constant 0 : i32
    %4 = arith.cmpi ne, %3, %c0_i32_1 : i32
    scf.if %4 {
      %cst_37 = arith.constant 0.000000e+00 : f32
      %65 = vector.broadcast %cst_37 : f32 to vector<8x128xf32>
      %c0_38 = arith.constant 0 : index
      %c0_39 = arith.constant 0 : index
      %66 = vector.load %arg6[%c0_38, %c0_39] : memref<8x128xf32, #tpu.memory_space<vmem>>, vector<8x128xf32>
      tpu.vector_store %arg6[%c0_38, %c0_39], %65 {strides = array<i32>} : memref<8x128xf32, #tpu.memory_space<vmem>>, vector<8x128xf32>,
    } else {
    }
    %c0 = arith.constant 0 : index
    %c0_2 = arith.constant 0 : index
    %c0_3 = arith.constant 0 : index
    %c0_4 = arith.constant 0 : index
    %5 = vector.load %arg3[%c0, %c0_2, %c0_3, %c0_4] : memref<1x3x8x128xf32, #tpu.memory_space<vmem>>, vector<1x1x8x128xf32>
    %6 = vector.shape_cast %5 : vector<1x1x8x128xf32> to vector<8x128xf32>
    %c0_5 = arith.constant 0 : index
    %c1 = arith.constant 1 : index
    %c0_6 = arith.constant 0 : index
    %c0_7 = arith.constant 0 : index
    %7 = vector.load %arg3[%c0_5, %c1, %c0_6, %c0_7] : memref<1x3x8x128xf32, #tpu.memory_space<vmem>>, vector<1x1x8x128xf32>
    %8 = vector.shape_cast %7 : vector<1x1x8x128xf32> to vector<8x128xf32>
    %c0_8 = arith.constant 0 : index
    %c2 = arith.constant 2 : index
    %c0_9 = arith.constant 0 : index
    %c0_10 = arith.constant 0 : index
    %9 = vector.load %arg3[%c0_8, %c2, %c0_9, %c0_10] : memref<1x3x8x128xf32, #tpu.memory_space<vmem>>, vector<1x1x8x128xf32>
    %10 = vector.shape_cast %9 : vector<1x1x8x128xf32> to vector<8x128xf32>
    %c0_11 = arith.constant 0 : index
    %c0_12 = arith.constant 0 : index
    %c0_13 = arith.constant 0 : index
    %c0_14 = arith.constant 0 : index
    %11 = vector.load %arg4[%c0_11, %c0_12, %c0_13, %c0_14] : memref<1x3x8x128xf32, #tpu.memory_space<vmem>>, vector<1x1x8x128xf32>
    %12 = vector.shape_cast %11 : vector<1x1x8x128xf32> to vector<8x128xf32>
    %c0_15 = arith.constant 0 : index
    %c1_16 = arith.constant 1 : index
    %c0_17 = arith.constant 0 : index
    %c0_18 = arith.constant 0 : index
    %13 = vector.load %arg4[%c0_15, %c1_16, %c0_17, %c0_18] : memref<1x3x8x128xf32, #tpu.memory_space<vmem>>, vector<1x1x8x128xf32>
    %14 = vector.shape_cast %13 : vector<1x1x8x128xf32> to vector<8x128xf32>
    %c0_19 = arith.constant 0 : index
    %c2_20 = arith.constant 2 : index
    %c0_21 = arith.constant 0 : index
    %c0_22 = arith.constant 0 : index
    %15 = vector.load %arg4[%c0_19, %c2_20, %c0_21, %c0_22] : memref<1x3x8x128xf32, #tpu.memory_space<vmem>>, vector<1x1x8x128xf32>
    %16 = vector.shape_cast %15 : vector<1x1x8x128xf32> to vector<8x128xf32>
    %17 = arith.subf %6, %12 : vector<8x128xf32>
    %18 = arith.subf %8, %14 : vector<8x128xf32>
    %19 = arith.subf %10, %16 : vector<8x128xf32>
    %20 = arith.addf %6, %12 : vector<8x128xf32>
    %cst = arith.constant 0.249023438 : f32
    %21 = vector.broadcast %cst : f32 to vector<8x128xf32>
    %22 = arith.mulf %21, %20 : vector<8x128xf32>
    %cst_23 = arith.constant 2.49804688 : f32
    %23 = vector.broadcast %cst_23 : f32 to vector<8x128xf32>
    %24 = arith.addf %23, %22 : vector<8x128xf32>
    %cst_24 = arith.constant 0.249023438 : f32
    %25 = vector.broadcast %cst_24 : f32 to vector<8x128xf32>
    %26 = arith.mulf %25, %20 : vector<8x128xf32>
    %cst_25 = arith.constant 2.49804688 : f32
    %27 = vector.broadcast %cst_25 : f32 to vector<8x128xf32>
    %28 = arith.subf %27, %26 : vector<8x128xf32>
    %29 = arith.mulf %24, %17 : vector<8x128xf32>
    %30 = arith.mulf %29, %17 : vector<8x128xf32>
    %cst_26 = arith.constant 4.000000e+00 : f32
    %31 = vector.broadcast %cst_26 : f32 to vector<8x128xf32>
    %32 = arith.mulf %31, %18 : vector<8x128xf32>
    %33 = arith.mulf %32, %18 : vector<8x128xf32>
    %34 = arith.addf %30, %33 : vector<8x128xf32>
    %35 = arith.mulf %28, %19 : vector<8x128xf32>
    %36 = arith.mulf %35, %19 : vector<8x128xf32>
    %37 = arith.addf %34, %36 : vector<8x128xf32>
    %cst_27 = arith.constant 16256.25 : f32
    %38 = vector.broadcast %cst_27 : f32 to vector<8x128xf32>
    %39 = arith.mulf %38, %37 : vector<8x128xf32>
    %cst_28 = arith.constant 9.99999993E-9 : f32
    %40 = vector.broadcast %cst_28 : f32 to vector<8x128xf32>
    %41 = arith.addf %39, %40 : vector<8x128xf32>
    %42 = math.sqrt %41 : vector<8x128xf32>
    %c1_i32 = arith.constant 1 : i32
    %43 = arith.muli %arg0, %c1_i32 : i32
    %44 = arith.addi %43, %arg2 : i32
    %c8_i32 = arith.constant 8 : i32
    %45 = arith.muli %44, %c8_i32 : i32
    %46 = tpu.iota {dimensions = array<i32: 0>} : vector<8x128xi32>
    %47 = tpu.iota {dimensions = array<i32: 1>} : vector<8x128xi32>
    %48 = vector.broadcast %45 : i32 to vector<8x128xi32>
    %49 = arith.addi %48, %46 : vector<8x128xi32>
    %c128_i32 = arith.constant 128 : i32
    %50 = vector.broadcast %c128_i32 : i32 to vector<8x128xi32>
    %51 = arith.muli %49, %50 : vector<8x128xi32>
    %52 = arith.addi %51, %47 : vector<8x128xi32>
    %c256_i32 = arith.constant 256 : i32
    %53 = vector.broadcast %c256_i32 : i32 to vector<8x128xi32>
    %54 = arith.cmpi slt, %52, %53 : vector<8x128xi32>
    %cst_29 = arith.constant 0.000000e+00 : f32
    %55 = vector.broadcast %cst_29 : f32 to vector<8x128xf32>
    %56 = arith.select %54, %42, %55 : vector<8x128xi1>, vector<8x128xf32>
    %c0_30 = arith.constant 0 : index
    %c0_31 = arith.constant 0 : index
    %57 = vector.load %arg6[%c0_30, %c0_31] : memref<8x128xf32, #tpu.memory_space<vmem>>, vector<8x128xf32>
    %58 = arith.addf %57, %56 : vector<8x128xf32>
    %c0_32 = arith.constant 0 : index
    %c0_33 = arith.constant 0 : index
    %59 = vector.load %arg6[%c0_32, %c0_33] : memref<8x128xf32, #tpu.memory_space<vmem>>, vector<8x128xf32>
    tpu.vector_store %arg6[%c0_32, %c0_33], %58 {strides = array<i32>} : memref<8x128xf32, #tpu.memory_space<vmem>>, vector<8x128xf32>,
    %c1_i32_34 = arith.constant 1 : i32
    %60 = arith.cmpi eq, %arg1, %c1_i32_34 : i32
    %c0_i32_35 = arith.constant 0 : i32
    %61 = arith.cmpi eq, %arg2, %c0_i32_35 : i32
    %62 = arith.andi %60, %61 : i1
    %63 = arith.extui %62 : i1 to i32
    %c0_i32_36 = arith.constant 0 : i32
    %64 = arith.cmpi ne, %63, %c0_i32_36 : i32
    scf.if %64 {
      %c0_37 = arith.constant 0 : index
      %c0_38 = arith.constant 0 : index
      %65 = vector.load %arg6[%c0_37, %c0_38] : memref<8x128xf32, #tpu.memory_space<vmem>>, vector<8x128xf32>
      %cst_39 = arith.constant dense<0.000000e+00> : vector<128xf32>
      %66 = vector.multi_reduction <add>, %65, %cst_39 [0] : vector<8x128xf32> to vector<128xf32>
      %67 = vector.shape_cast %66 : vector<128xf32> to vector<1x128xf32>
      %c0_40 = arith.constant 0 : index
      %c0_41 = arith.constant 0 : index
      %68 = vector.load %arg5[%c0_40, %c0_41] : memref<1x128xf32, #tpu.memory_space<vmem>>, vector<1x128xf32>
      tpu.vector_store %arg5[%c0_40, %c0_41], %67 {strides = array<i32>} : memref<1x128xf32, #tpu.memory_space<vmem>>, vector<1x128xf32>,
    } else {
    }
    return
  }
  func.func @transform_0(%arg0: i32, %arg1: i32, %arg2: i32) -> (i32, i32, i32, i32) {
    %c1_i32 = arith.constant 1 : i32
    %0 = arith.muli %arg0, %c1_i32 : i32
    %1 = arith.addi %0, %arg2 : i32
    %c0_i32 = arith.constant 0 : i32
    %c0_i32_0 = arith.constant 0 : i32
    %c0_i32_1 = arith.constant 0 : i32
    return %arg1, %c0_i32, %1, %c0_i32_0 : i32, i32, i32, i32
  }
  func.func @transform_1(%arg0: i32, %arg1: i32, %arg2: i32) -> (i32, i32, i32, i32) {
    %c1_i32 = arith.constant 1 : i32
    %0 = arith.muli %arg0, %c1_i32 : i32
    %1 = arith.addi %0, %arg2 : i32
    %c0_i32 = arith.constant 0 : i32
    %c0_i32_0 = arith.constant 0 : i32
    %c0_i32_1 = arith.constant 0 : i32
    return %arg1, %c0_i32, %1, %c0_i32_0 : i32, i32, i32, i32
  }
  func.func @transform_2(%arg0: i32, %arg1: i32, %arg2: i32) -> (i32, i32) {
    %c0_i32 = arith.constant 0 : i32
    %c0_i32_0 = arith.constant 0 : i32
    return %c0_i32, %arg0 : i32, i32
  }
}

</mosaic_0001>

<bundles_post_ra>
// kernel: tpu_custom_call.1
= control target key start
LH: loop header
LB: loop body
LE: loop exit
PB: predicated region body
PF: predicated region fallthrough
CT: control target
= control target key end

     0   :  { %7 = vsyncpa [#allocation4], 0  ;;  %s793_s0 = inlined_call_operand.hbm [shape: f32[2,3,8,128], index: 0, kind: input, shape index: {}]   ;;  %s794_s1 = inlined_call_operand.hbm [shape: f32[2,3,8,128], index: 1, kind: input, shape index: {}]   ;;  %s795_s2 = inlined_call_operand.hbm [shape: f32[1,128], index: 2, kind: output, shape index: {}]  }
   0x1   :  { %9 = vsyncpa [#allocation4 + $0x1], 0 }
   0x2   :  { %10 = vsyncpa [#allocation7], 0 }
   0x3   :  { %12 = vsyncpa [#allocation7 + $0x1], 0 }
   0x4   :  { %13 = vsyncpa [#allocation5], 0  ;;  %s655_s9 = smov 0   ;;  %s657_s10 = smov 0  }
   0x5   :  { %s659_s11 = smov 0   ;;  %s661_s12 = smov 0  }
   0x6   :  { %s663_s13 = smov 0   ;;  %s665_s14 = smov 0  }
   0x7 LB: > { %s399_s15 = sadd.s32 4294967295, %s632_s14   ;;  %s34_s16 = sadd.s32 1, %s628_s13  ;;  %s632_s14 = sphi %s665_s14, %s19_s14   ;;  %s628_s13 = sphi %s663_s13, %s804_s13   ;;  %s624_s12 = sphi %s661_s12, %s803_s12   ;;  %s620_s11 = sphi %s659_s11, %s802_s11   ;;  %s616_s10 = sphi %s657_s10, %s801_s10   ;;  %s612_s9 = sphi %s655_s9, %s800_s9  }
   0x8   : > { %p36_p0 = scmp.ge.s32.totalorder %s34_s16, 2  ;;  %s49_s17 = sadd.s32 1, %s620_s11 }
   0x9   : > { %p56_p1 = scmp.ne.s32.totalorder %s620_s11, %s616_s10  ;;  %p57_p2 = scmp.eq.s32.totalorder %s632_s14, 0 }
   0xa   : > { %s806_s16 = smov (%p36_p0, %s34_s16), 0  ;;  %p62_p4 = scmp.ne.s32.totalorder %s616_s10, %s612_s9 }
   0xb   : > { %p58_p3 = por %p57_p2, %p56_p1  ;;  %s44_s18 = ssub.s32 %s628_s13, %s806_s16 }
   0xc   : > { %p63_p5 = scmp.eq.s32.totalorder %s399_s15, 0  ;;  %p47_p6 = scmp.eq.s32.totalorder %s44_s18, 0 }
   0xd   : > { %p437_p8 = scmp.lt.s32.totalorder %s632_s14, 2  ;;  %s705_s21 = sand.u32 1, %s620_s11  }
   0xe   : > { %p696_p7 = por %p63_p5, %p62_p4  ;;  %s418_s22 = smul.u32 384, %s628_s13 }
   0xf   : > { %s702_s20 = scalar_select %p47_p6, %s620_s11, %s49_s17  }
  0x10   : > { %s417_s23 = smul.u32 24, %s705_s21  ;;  %s154_s26 = scalar_lea.hbm %s793_s0, %s418_s22 }
  0x11   : > { %p714_p9 = pnand %p437_p8, %p58_p3  ;;  %s143_s30 = scalar_lea.sflag [#allocation4], %s705_s21 }
  0x12   : > { %s146_s28 = scalar_lea.vmem [#allocation3], %s417_s23  ;;  %s634_s4 = smov [#allocation3]  }
  0x13   : > { %s155_s29 = sshll.u32 %s146_s28, 4  ;;  %p496_p10 = pneg %p714_p9  ;;  %s156_s29 = int_to_ptr.vmem [resolvable:$true] %s155_s29 }
  0x14   : > { %s507_s3 = scalar_lea.vmem %s156_s29, 384  ;;  %s512_s5 = sshll.u32 %s634_s4, 4  ;;  %s513_s5 = int_to_ptr.vmem [resolvable:$false] %s512_s5 }
  0x15   : > { %p508_p11 = scmp.ne.s32.totalorder %s156_s29, %s507_s3  ;;  %s514_s6 = scalar_lea.vmem %s513_s5, 768 }
  0x16   : > { %p515_p0 = scmp.lt.s32.totalorder %s156_s29, %s513_s5  ;;  %p516_p1 = scmp.lt.s32.totalorder %s514_s6, %s507_s3 }
  0x17   : > { %p510_p12 = pnand %p508_p11, %p496_p10 }
  0x18   : > { %p517_p2 = por %p516_p1, %p515_p0 }
  0x19   : > { %p511_p13 = pneg %p510_p12 }
  0x1b   : > { %p518_p3 = pnand %p517_p2, %p511_p13 }
  0x1d   : > { %521 = shalt.err (!%p518_p3)
}
  0x1e   : > { %s635_s7 = smov 128   ;;  %s636_s8 = smov 8  }
  0x1f   : > { %433 = dma.hbm_to_vmem [thread:$0]  (!%p714_p9), %s154_s26, 384, %s156_s29, %s143_s30, %s635_s7, %s635_s7, %s636_s8  }
  0x20   : > { %p404_p4 = scmp.ge.s32.totalorder %s632_s14, 1  ;;  %p186_p5 = scmp.lt.s32.totalorder %s632_s14, 3 }
  0x21   : > { %s177_s24 = scalar_lea.hbm %s794_s1, %s418_s22  ;;  %s169_s25 = scalar_lea.vmem [#allocation6], %s417_s23 }
  0x22   : > { %p728_p6 = pnand %p404_p4, %p186_p5  ;;  %s178_s28 = sshll.u32 %s169_s25, 4  ;;  %s179_s28 = int_to_ptr.vmem [resolvable:$true] %s178_s28 }
  0x23   : > { %s166_s3 = scalar_lea.sflag [#allocation7], %s705_s21  ;;  %s535_s4 = scalar_lea.vmem %s179_s28, 384 }
  0x24   : > { %p536_p8 = scmp.ne.s32.totalorder %s179_s28, %s535_s4  ;;  %s637_s26 = smov [#allocation6]  }
  0x25   : > { %s540_s29 = sshll.u32 %s637_s26, 4  ;;  %s541_s29 = int_to_ptr.vmem [resolvable:$false] %s540_s29 }
  0x26   : > { %p538_p11 = pnand %p536_p8, %p496_p10  ;;  %s542_s30 = scalar_lea.vmem %s541_s29, 768 }
  0x27   : > { %p543_p13 = scmp.lt.s32.totalorder %s179_s28, %s541_s29  ;;  %p544_p0 = scmp.lt.s32.totalorder %s542_s30, %s535_s4 }
  0x28   : > { %p539_p12 = pneg %p538_p11 }
  0x29   : > { %p545_p1 = por %p544_p0, %p543_p13 }
  0x2b   : > { %p546_p2 = pnand %p545_p1, %p539_p12 }
  0x2d   : > { %549 = shalt.err (!%p546_p2)
}
  0x2e   : > { %436 = dma.hbm_to_vmem [thread:$0]  (!%p714_p9), %s177_s24, 384, %s179_s28, %s166_s3, %s635_s7, %s635_s7, %s636_s8  }
  0x2f   : > { %190 = sbr.rel (%p728_p6) target bundleno = 139 (0x8b), region = 28  ;;  %s192_s21 = sand.u32 (!%p728_p6), 1, %s616_s10  }
  0x30   : > { %s421_s22 = smul.u32 (!%p728_p6), 24, %s192_s21  ;;  %s193_s23 = scalar_lea.sflag (!%p728_p6), [#allocation4], %s192_s21 }
  0x32   : > { %s196_s5 = scalar_lea.vmem (!%p728_p6), [#allocation3], %s421_s22 }
  0x34   : > { %599 = dma.done.wait (%p696_p7), %s193_s23, 384  }
  0x35   : > { %601 = vsyncadd (%p696_p7), %s193_s23, 4294966912  ;;  %s202_s6 = scalar_lea.sflag [#allocation7], %s192_s21  ;;  %s205_s17 = scalar_lea.vmem [#allocation6], %s421_s22 }
  0x36   : > { %603 = dma.done.wait (%p696_p7), %s202_s6, 384  }
  0x37   : > { %605 = vsyncadd (%p696_p7), %s202_s6, 4294966912  ;;  %p228_p9 = scmp.eq.s32.totalorder %s624_s12, 0 }
  0x38   : > { %v638_v0 = vmov (%p228_p9), 0.0  }
  0x39   : > { %233 = sbr.rel (!%p228_p9) target bundleno = 62 (0x3e), region = 40  ;;  %234 = vst [vmem:[#allocation2] sm:$0xff] (%p228_p9), %v638_v0 }
  0x3e PF: > { %v235_v1 = vld [vmem:[%s196_s5] sm:$0xff]  ;;  %v406_v2 = vld [vmem:[%s196_s5 + $0x8] sm:$0xff]  ;;  %v407_v3 = vld [vmem:[%s196_s5 + $0x10] sm:$0xff]  ;;  %p284_p10 = scmp.eq.s32.totalorder %s624_s12, 1  ;;  %v271_v24 = vlaneseq }
  0x3f   : > { %v240_v4 = vld [vmem:[%s205_s17] sm:$0xff]  ;;  %v408_v5 = vld [vmem:[%s205_s17 + $0x8] sm:$0xff]  ;;  %v409_v6 = vld [vmem:[%s205_s17 + $0x10] sm:$0xff] }
  0x40   : > { %v246_v7 = vsub.f32 %v406_v2, %v408_v5  ;;  %v248_v8 = vadd.f32 %v240_v4, %v235_v1  ;;  %v245_v9 = vsub.f32 %v235_v1, %v240_v4  ;;  %v247_v10 = vsub.f32 %v407_v3, %v409_v6  ;;  %v281_v33 = vld [vmem:[#allocation2] sm:$0xff] }
  0x41   : > { %v272_v25 = vshrl.u32 %v271_v24, 7  ;;  %v274_v26 = vand.u32 127, %v271_v24 }
  0x42   : > { %v249_v11 = vmul.f32 0.24902344, %v248_v8  ;;  %v254_v12 = vmul.f32 4.0, %v246_v7 }
  0x43   : > { %v277_v27 = vmul.u32 128, %v272_v25 }
  0x44   : > { %v250_v13 = vadd.f32 2.4980469, %v249_v11  ;;  %v251_v14 = vsub.f32 2.4980469, %v249_v11  ;;  %v255_v16 = vmul.f32 %v254_v12, %v246_v7 }
  0x45   : > { %v278_v28 = vadd.s32 %v277_v27, %v274_v26 }
  0x46   : > { %v252_v15 = vmul.f32 %v250_v13, %v245_v9  ;;  %v257_v17 = vmul.f32 %v251_v14, %v247_v10 }
  0x47   : > { %vm279_vm2 = vcmp.lt.s32.totalorder %v278_v28, 256 }
  0x48   : > { %v253_v18 = vmul.f32 %v252_v15, %v245_v9  ;;  %v258_v19 = vmul.f32 %v257_v17, %v247_v10 }
  0x4a   : > { %v256_v20 = vadd.f32 %v255_v16, %v253_v18 }
  0x4c   : > { %v259_v21 = vadd.f32 %v258_v19, %v256_v20 }
  0x4e   : > { %v260_v22 = vmul.f32 16256.25, %v259_v21 }
  0x50   : > { %v261_v23 = vadd.f32 1e-08, %v260_v22 }
  0x52   : > { %492 = vrsqrt.f32 %v261_v23  ;;  %vm264_vm0 = vcmp.eq.f32.partialorder %v261_v23, inf  ;;  %v267_v30 = vand.u32 2147483648, %v261_v23  ;;  %vm266_vm1 = vcmp.eq.f32.partialorder %v261_v23, 0.0 }
  0x5f   : > { %v493_v29 = vpop.eup %492 }
  0x60   : > { %v263_v31 = vmul.f32 %v493_v29, %v261_v23 }
  0x62   : > { %v265_v32 = vsel %vm264_vm0, %v261_v23, %v263_v31 }
  0x63   : > { %v268_v34 = vsel %vm266_vm1, %v267_v30, %v265_v32  ;;  %288 = sbr.rel (!%p284_p10) target bundleno = 124 (0x7c), region = 44 }
  0x64   : > { %v280_v35 = vsel %vm279_vm2, %v268_v34, 0.0 }
  0x65   : > { %v282_v36 = vadd.f32 %v281_v33, %v280_v35 }
  0x67   : > { %283 = vst [vmem:[#allocation2] sm:$0xff] %v282_v36 }
  0x6e   : > { %v289_v37 = vld [vmem:[#allocation2] sm:$0xff] }
  0x6f   : > { %v290_v38 = vrot.slane %v289_v37, 4 }
  0x71   : > { %v291_v39 = vadd.f32 %v290_v38, %v289_v37 }
  0x73   : > { %v292_v40 = vrot.slane %v291_v39, 2 }
  0x75   : > { %v293_v41 = vadd.f32 %v292_v40, %v291_v39 }
  0x77   : > { %v294_v42 = vrot.slane %v293_v41, 1 }
  0x79   : > { %v295_v43 = vadd.f32 %v294_v42, %v293_v41 }
  0x7b   : > { %296 = vst [vmem:[#allocation8] sm:$0x1] %v295_v43 }
  0x7c PF: > { %p760_p7 = scmp.eq.s32.totalorder %s399_s15, 1  ;;  %s639_s27 = smov [#allocation8]  }
  0x7d   : > { %s306_s7 = sshll.u32 %s639_s27, 4  ;;  %s307_s7 = int_to_ptr.vmem [resolvable:$true] %s306_s7 }
  0x7e   : > { %s550_s12 = scalar_lea.vmem %s307_s7, 16  ;;  %s556_s8 = scalar_lea.vmem %s307_s7, 32 }
  0x7f   : > { %p551_p3 = scmp.ne.s32.totalorder %s307_s7, %s550_s12  ;;  %p557_p6 = scmp.lt.s32.totalorder %s307_s7, %s307_s7 }
  0x80   : > { %p558_p8 = scmp.lt.s32.totalorder %s556_s8, %s550_s12 }
  0x81   : > { %p552_p4 = pnand %p551_p3, %p760_p7 }
  0x82   : > { %p559_p11 = por %p558_p8, %p557_p6 }
  0x83   : > { %p553_p5 = pneg %p552_p4 }
  0x85   : > { %p560_p12 = pnand %p559_p11, %p553_p5 }
  0x87   : > { %563 = shalt.err (!%p560_p12)
}
  0x88   : > { %427 = dma.vmem_to_hbm [thread:$0]  (%p760_p7), %s307_s7, 16, %s795_s2, [#allocation5]  }
  0x89   : > { %607 = dma.done.wait (%p760_p7), [#allocation5], 16  }
  0x8a   : > { %609 = vsyncadd (%p760_p7), [#allocation5], 4294967280 }
  0x8b PF: > { %s19_s14 = sadd.s32 1, %s632_s14   ;;  %s800_s9 = smov %s616_s10 }
  0x8c   : > { %p16_p13 = scmp.ge.s32.totalorder %s19_s14, 4   ;;  %s801_s10 = smov %s620_s11 }
  0x8d   : > { %s802_s11 = smov %s702_s20  ;;  %s803_s12 = smov %s628_s13 }
  0x8e   : > { %s804_s13 = smov %s806_s16  ;;  %18 = sbr.rel (!%p16_p13) target bundleno = 7 (0x7), region = 91 }
  0x93   :  { %319 = vsyncpa [#allocation4], 1 }
  0x94   :  { %321 = vsyncpa [#allocation4 + $0x1], 1 }
  0x95   :  { %322 = vsyncpa [#allocation7], 1 }
  0x96   :  { %324 = vsyncpa [#allocation7 + $0x1], 1 }
  0x97   :  { %325 = vsyncpa [#allocation5], 1 }
  0x98   :  { %327 = vsyncpa [#allocation5 + $0x1], 1 }

</bundles_post_ra>
